<compile_context>
chip_gen: v5e
topology: v5e:2x2
jax: 0.10.0
libtpu: 0.0.40
codegen_flags: <defaults>
</compile_context>

<pallas_src>
import jax
import jax.numpy as jnp
from jax.experimental import pallas as pl
from jax.experimental.pallas import tpu as pltpu

C, H, W = 4, 16, 16
D = C * H * W                 # 1024 flattened features (lane axis, 8*128)
HIDDEN = 32
MEAN = 0.0
STD = 0.3
SAMPLE_SIZE = 20
S_PAD = 24                    # SAMPLE_SIZE rounded up to a multiple of 8


def base_model_jax(params, x_flat):
    """Synthetic base model: flatten -> dense(HIDDEN) -> relu -> dense(1) -> sigmoid."""
    w1, b1, w2, b2 = params
    h = jnp.maximum(x_flat @ w1 + b1, 0.0)
    logit = h @ w2 + b2
    return h, jax.nn.sigmoid(logit)          # (features, prob) like the PyTorch contract


def smooth_kernel(x_ref, gnorm_ref, noise_ref, w1_ref, b1_ref, w2t_ref,
                  b2_ref, o_ref):
    # All samples at once: (S_PAD, D) = (1, D) + (S_PAD, D) * (1, D)
    xn = x_ref[...] + noise_ref[...] * gnorm_ref[...]

    # Batched base-model forward: one MXU matmul instead of 80 M=1 dots.
    h = jnp.dot(xn, w1_ref[...], preferred_element_type=jnp.float32)
    h = jnp.maximum(h + b1_ref[...], 0.0)                       # (S_PAD, HIDDEN)

    # (., 32) @ (32, 1) logit done as VPU multiply + lane reduce (no MXU fill/drain).
    logit = jnp.sum(h * w2t_ref[...], axis=-1, keepdims=True) + b2_ref[...]
    prob = 1.0 / (1.0 + jnp.exp(-logit))                        # (S_PAD, 1)

    # Mask padding rows, then mean over the real SAMPLE_SIZE samples.
    row = jax.lax.broadcasted_iota(jnp.int32, (S_PAD, 1), 0)
    prob = jnp.where(row < SAMPLE_SIZE, prob, 0.0)

    # TODO(synk): the PyTorch module also prints a per-sample (prob > 0.5) 0/1
    # list; it does not affect the returned value and is omitted here.
    o_ref[...] = jnp.sum(prob, axis=0, keepdims=True) * (1.0 / SAMPLE_SIZE)


def smooth_model_forward(x_nchw, params, seed):
    w1, b1, w2, b2 = params
    x_flat = x_nchw.reshape(1, D).astype(jnp.float32)

    # One-time autograd step: grad of max(base_output) w.r.t. the input.
    grad_flat = jax.grad(
        lambda xx: jnp.max(base_model_jax(params, xx)[1]))(x_flat)

    # grad_data = |grad|; grad -= grad.min(dim=1); grad /= grad.max(dim=1)
    # (dim=1 of NCHW == channel axis).  One-time tiny op -> plain JAX.
    g = jnp.abs(grad_flat).reshape(1, C, H, W)
    g = g - jnp.min(g, axis=1, keepdims=True)
    gmax = jnp.max(g, axis=1, keepdims=True)
    # Guard only the exact-zero case (the reference would produce NaN there).
    g = g / jnp.where(gmax == 0.0, 1.0, gmax)
    gnorm = g.reshape(1, D)

    # Batched Gaussian noise draw.  Done with jax.random in the wrapper (the
    # in-kernel TPU PRNG has no CPU/interpret lowering); statistically
    # equivalent to per-sample torch.normal, not bit-identical.
    noise = MEAN + STD * jax.random.normal(
        jax.random.PRNGKey(seed), (S_PAD, D), dtype=jnp.float32)

    in_specs = [pl.BlockSpec(memory_space=pltpu.MemorySpace.VMEM)
                for _ in range(7)]
    out_spec = pl.BlockSpec(memory_space=pltpu.MemorySpace.VMEM)

    return pl.pallas_call(
        smooth_kernel,
        out_shape=jax.ShapeDtypeStruct((1, 1), jnp.float32),
        in_specs=in_specs,
        out_specs=out_spec,
    )(x_flat, gnorm, noise, w1, b1, w2.T, b2)


if __name__ == "__main__":
    key = jax.random.PRNGKey(0)
    kx, k1, k2 = jax.random.split(key, 3)
    x = jax.random.normal(kx, (1, C, H, W), dtype=jnp.float32)

    # Deterministic synthetic base-model parameters (flattened layout).
    w1 = jax.random.normal(k1, (D, HIDDEN), dtype=jnp.float32) * 0.05
    b1 = jnp.zeros((1, HIDDEN), jnp.float32)
    w2 = jax.random.normal(k2, (HIDDEN, 1), dtype=jnp.float32) * 0.1
    b2 = jnp.zeros((1, 1), jnp.float32)
    params = (w1, b1, w2, b2)

    out = smooth_model_forward(x, params, seed=1234)
    out = jax.block_until_ready(out)
    assert out.shape == (1, 1)
    assert bool(jnp.isfinite(out).all())
    print("KERNEL_OK")
</pallas_src>

<mosaic_0001>
module attributes {stable_mosaic.version = 11 : i64} {
  func.func @smooth_kernel(%arg0: memref<1x1024xf32, #tpu.memory_space<vmem>>, %arg1: memref<1x1024xf32, #tpu.memory_space<vmem>>, %arg2: memref<24x1024xf32, #tpu.memory_space<vmem>>, %arg3: memref<1024x32xf32, #tpu.memory_space<vmem>>, %arg4: memref<1x32xf32, #tpu.memory_space<vmem>>, %arg5: memref<1x32xf32, #tpu.memory_space<vmem>>, %arg6: memref<1x1xf32, #tpu.memory_space<vmem>>, %arg7: memref<1x1xf32, #tpu.memory_space<vmem>>) attributes {dimension_semantics = [], scalar_prefetch = 0 : i64, scratch_operands = 0 : i64, tpu.core_type = #tpu.core_type<tc>} {
    %c0 = arith.constant 0 : index
    %c0_0 = arith.constant 0 : index
    %0 = vector.load %arg0[%c0, %c0_0] : memref<1x1024xf32, #tpu.memory_space<vmem>>, vector<1x1024xf32>
    %c0_1 = arith.constant 0 : index
    %c0_2 = arith.constant 0 : index
    %1 = vector.load %arg2[%c0_1, %c0_2] : memref<24x1024xf32, #tpu.memory_space<vmem>>, vector<24x1024xf32>
    %c0_3 = arith.constant 0 : index
    %c0_4 = arith.constant 0 : index
    %2 = vector.load %arg1[%c0_3, %c0_4] : memref<1x1024xf32, #tpu.memory_space<vmem>>, vector<1x1024xf32>
    %3 = vector.broadcast %2 : vector<1x1024xf32> to vector<24x1024xf32>
    %4 = arith.mulf %1, %3 : vector<24x1024xf32>
    %5 = vector.broadcast %0 : vector<1x1024xf32> to vector<24x1024xf32>
    %6 = arith.addf %5, %4 : vector<24x1024xf32>
    %c0_5 = arith.constant 0 : index
    %c0_6 = arith.constant 0 : index
    %7 = vector.load %arg3[%c0_5, %c0_6] : memref<1024x32xf32, #tpu.memory_space<vmem>>, vector<1024x32xf32>
    %cst = arith.constant dense<0.000000e+00> : vector<24x32xf32>
    %8 = tpu.matmul %6, %7, %cst {dimension_numbers = #tpu.dot_dimension_numbers<[1], [0], [0], [1], [0, 0, 1, 1], [], []>} : vector<24x1024xf32>, vector<1024x32xf32>, vector<24x32xf32> -> vector<24x32xf32>
    %c0_7 = arith.constant 0 : index
    %c0_8 = arith.constant 0 : index
    %9 = vector.load %arg4[%c0_7, %c0_8] : memref<1x32xf32, #tpu.memory_space<vmem>>, vector<1x32xf32>
    %10 = vector.broadcast %9 : vector<1x32xf32> to vector<24x32xf32>
    %11 = arith.addf %8, %10 : vector<24x32xf32>
    %cst_9 = arith.constant 0.000000e+00 : f32
    %12 = vector.broadcast %cst_9 : f32 to vector<24x32xf32>
    %13 = arith.maximumf %11, %12 : vector<24x32xf32>
    %c0_10 = arith.constant 0 : index
    %c0_11 = arith.constant 0 : index
    %14 = vector.load %arg5[%c0_10, %c0_11] : memref<1x32xf32, #tpu.memory_space<vmem>>, vector<1x32xf32>
    %15 = vector.broadcast %14 : vector<1x32xf32> to vector<24x32xf32>
    %16 = arith.mulf %13, %15 : vector<24x32xf32>
    %cst_12 = arith.constant dense<0.000000e+00> : vector<24xf32>
    %17 = vector.multi_reduction <add>, %16, %cst_12 [1] : vector<24x32xf32> to vector<24xf32>
    %18 = vector.shape_cast %17 : vector<24xf32> to vector<24x1xf32>
    %c0_13 = arith.constant 0 : index
    %c0_14 = arith.constant 0 : index
    %19 = vector.load %arg6[%c0_13, %c0_14] : memref<1x1xf32, #tpu.memory_space<vmem>>, vector<1x1xf32>
    %20 = vector.broadcast %19 : vector<1x1xf32> to vector<24x1xf32>
    %21 = arith.addf %18, %20 : vector<24x1xf32>
    %cst_15 = arith.constant 0.000000e+00 : f32
    %22 = vector.broadcast %cst_15 : f32 to vector<24x1xf32>
    %23 = arith.subf %22, %21 : vector<24x1xf32>
    %24 = math.exp %23 : vector<24x1xf32>
    %cst_16 = arith.constant 1.000000e+00 : f32
    %25 = vector.broadcast %cst_16 : f32 to vector<24x1xf32>
    %26 = arith.addf %25, %24 : vector<24x1xf32>
    %cst_17 = arith.constant 1.000000e+00 : f32
    %27 = vector.broadcast %cst_17 : f32 to vector<24x1xf32>
    %28 = arith.divf %27, %26 : vector<24x1xf32>
    %29 = tpu.iota {dimensions = array<i32: 0>} : vector<24x1xi32>
    %c20_i32 = arith.constant 20 : i32
    %30 = vector.broadcast %c20_i32 : i32 to vector<24x1xi32>
    %31 = arith.cmpi slt, %29, %30 : vector<24x1xi32>
    %cst_18 = arith.constant 0.000000e+00 : f32
    %32 = vector.broadcast %cst_18 : f32 to vector<24x1xf32>
    %33 = arith.select %31, %28, %32 : vector<24x1xi1>, vector<24x1xf32>
    %cst_19 = arith.constant dense<0.000000e+00> : vector<1xf32>
    %34 = vector.multi_reduction <add>, %33, %cst_19 [0] : vector<24x1xf32> to vector<1xf32>
    %35 = vector.shape_cast %34 : vector<1xf32> to vector<1x1xf32>
    %cst_20 = arith.constant 5.000000e-02 : f32
    %36 = vector.broadcast %cst_20 : f32 to vector<1x1xf32>
    %37 = arith.mulf %35, %36 : vector<1x1xf32>
    %c0_21 = arith.constant 0 : index
    %c0_22 = arith.constant 0 : index
    %38 = vector.load %arg7[%c0_21, %c0_22] : memref<1x1xf32, #tpu.memory_space<vmem>>, vector<1x1xf32>
    tpu.vector_store %arg7[%c0_21, %c0_22], %37 {strides = array<i32>} : memref<1x1xf32, #tpu.memory_space<vmem>>, vector<1x1xf32>,
    return
  }
}

</mosaic_0001>

<bundles_post_ra>
// kernel: tpu_custom_call.1
= control target key start
LH: loop header
LB: loop body
LE: loop exit
PB: predicated region body
PF: predicated region fallthrough
CT: control target
= control target key end

     0   :  { %s1264_s0 = inlined_call_operand.vmem [shape: f32[1,1024], index: 0, kind: input, shape index: {}]   ;;  %s1265_s1 = inlined_call_operand.vmem [shape: f32[1,1024], index: 1, kind: input, shape index: {}]   ;;  %s1266_s2 = inlined_call_operand.vmem [shape: f32[24,1024], index: 2, kind: input, shape index: {}]   ;;  %s1267_s3 = inlined_call_operand.vmem [shape: f32[1024,32], index: 3, kind: input, shape index: {}]   ;;  %s1268_s4 = inlined_call_operand.vmem [shape: f32[1,32], index: 4, kind: input, shape index: {}]   ;;  %s1269_s5 = inlined_call_operand.vmem [shape: f32[1,32], index: 5, kind: input, shape index: {}]   ;;  %s1270_s6 = inlined_call_operand.<no memory space> [shape: f32[1,1], index: 6, kind: input, shape index: {}]   ;;  %s1271_s7 = inlined_call_operand.hbm [shape: f32[1,1], index: 7, kind: output, shape index: {}]  }
   0x1   :  { %v12_v0 = vstv %s1270_s6 }
   0x2   :  { %13 = vst [vmem:[#allocation2] sm:$0x1] %v12_v0 }
   0x3   :  { %v152_v1 = vld [vmem:[%s1267_s3 + $0x78] sm:$0xff]  ;;  %v151_v3 = vld [vmem:[%s1267_s3 + $0x70] sm:$0xff]  ;;  %v150_v7 = vld [vmem:[%s1267_s3 + $0x68] sm:$0xff] }
   0x4   :  { %v184_v2 = vld [vmem:[%s1267_s3 + $0x178] sm:$0xff]  ;;  %269 = vmatpush.msra.mxu0 %v152_v1  ;;  %v183_v5 = vld [vmem:[%s1267_s3 + $0x170] sm:$0xff]  ;;  %v182_v9 = vld [vmem:[%s1267_s3 + $0x168] sm:$0xff] }
   0x5   :  { %321 = vmatpush.msra.mxu2 %v184_v2  ;;  %v168_v4 = vld [vmem:[%s1267_s3 + $0xf8] sm:$0xff]  ;;  %v167_v8 = vld [vmem:[%s1267_s3 + $0xf0] sm:$0xff]  ;;  %v166_v11 = vld [vmem:[%s1267_s3 + $0xe8] sm:$0xff] }
   0x6   :  { %v200_v6 = vld [vmem:[%s1267_s3 + $0x1f8] sm:$0xff]  ;;  %295 = vmatpush.msra.mxu1 %v168_v4  ;;  %270 = vmatpush.msra.mxu0 %v151_v3  ;;  %v199_v10 = vld [vmem:[%s1267_s3 + $0x1f0] sm:$0xff]  ;;  %v149_v12 = vld [vmem:[%s1267_s3 + $0x60] sm:$0xff] }
   0x7   :  { %347 = vmatpush.msra.mxu3 %v200_v6  ;;  %322 = vmatpush.msra.mxu2 %v183_v5  ;;  %v181_v13 = vld [vmem:[%s1267_s3 + $0x160] sm:$0xff]  ;;  %v198_v14 = vld [vmem:[%s1267_s3 + $0x1e8] sm:$0xff]  ;;  %v148_v17 = vld [vmem:[%s1267_s3 + $0x58] sm:$0xff] }
   0x8   :  { %296 = vmatpush.msra.mxu1 %v167_v8  ;;  %271 = vmatpush.msra.mxu0 %v150_v7  ;;  %v165_v15 = vld [vmem:[%s1267_s3 + $0xe0] sm:$0xff]  ;;  %v180_v18 = vld [vmem:[%s1267_s3 + $0x158] sm:$0xff]  ;;  %v147_v21 = vld [vmem:[%s1267_s3 + $0x50] sm:$0xff] }
   0x9   :  { %348 = vmatpush.msra.mxu3 %v199_v10  ;;  %323 = vmatpush.msra.mxu2 %v182_v9  ;;  %v197_v16 = vld [vmem:[%s1267_s3 + $0x1e0] sm:$0xff]  ;;  %v164_v19 = vld [vmem:[%s1267_s3 + $0xd8] sm:$0xff]  ;;  %v179_v22 = vld [vmem:[%s1267_s3 + $0x150] sm:$0xff] }
   0xa   :  { %297 = vmatpush.msra.mxu1 %v166_v11  ;;  %272 = vmatpush.msra.mxu0 %v149_v12  ;;  %v196_v20 = vld [vmem:[%s1267_s3 + $0x1d8] sm:$0xff]  ;;  %v163_v23 = vld [vmem:[%s1267_s3 + $0xd0] sm:$0xff]  ;;  %v146_v25 = vld [vmem:[%s1267_s3 + $0x48] sm:$0xff] }
   0xb   :  { %349 = vmatpush.msra.mxu3 %v198_v14  ;;  %324 = vmatpush.msra.mxu2 %v181_v13  ;;  %v195_v24 = vld [vmem:[%s1267_s3 + $0x1d0] sm:$0xff]  ;;  %v178_v26 = vld [vmem:[%s1267_s3 + $0x148] sm:$0xff]  ;;  %v145_v29 = vld [vmem:[%s1267_s3 + $0x40] sm:$0xff] }
   0xc   :  { %298 = vmatpush.msra.mxu1 %v165_v15  ;;  %273 = vmatpush.msra.mxu0 %v148_v17  ;;  %v162_v27 = vld [vmem:[%s1267_s3 + $0xc8] sm:$0xff]  ;;  %v177_v30 = vld [vmem:[%s1267_s3 + $0x140] sm:$0xff]  ;;  %v144_v33 = vld [vmem:[%s1267_s3 + $0x38] sm:$0xff] }
   0xd   :  { %350 = vmatpush.msra.mxu3 %v197_v16  ;;  %325 = vmatpush.msra.mxu2 %v180_v18  ;;  %v194_v28 = vld [vmem:[%s1267_s3 + $0x1c8] sm:$0xff]  ;;  %v161_v31 = vld [vmem:[%s1267_s3 + $0xc0] sm:$0xff]  ;;  %v176_v34 = vld [vmem:[%s1267_s3 + $0x138] sm:$0xff] }
   0xe   :  { %299 = vmatpush.msra.mxu1 %v164_v19  ;;  %274 = vmatpush.msra.mxu0 %v147_v21  ;;  %v193_v32 = vld [vmem:[%s1267_s3 + $0x1c0] sm:$0xff]  ;;  %v160_v35 = vld [vmem:[%s1267_s3 + $0xb8] sm:$0xff]  ;;  %v143_v37 = vld [vmem:[%s1267_s3 + $0x30] sm:$0xff] }
   0xf   :  { %351 = vmatpush.msra.mxu3 %v196_v20  ;;  %326 = vmatpush.msra.mxu2 %v179_v22  ;;  %v192_v36 = vld [vmem:[%s1267_s3 + $0x1b8] sm:$0xff]  ;;  %v175_v38 = vld [vmem:[%s1267_s3 + $0x130] sm:$0xff]  ;;  %v142_v41 = vld [vmem:[%s1267_s3 + $0x28] sm:$0xff] }
  0x10   :  { %300 = vmatpush.msra.mxu1 %v163_v23  ;;  %275 = vmatpush.msra.mxu0 %v146_v25  ;;  %v159_v39 = vld [vmem:[%s1267_s3 + $0xb0] sm:$0xff]  ;;  %v174_v42 = vld [vmem:[%s1267_s3 + $0x128] sm:$0xff]  ;;  %v141_v45 = vld [vmem:[%s1267_s3 + $0x20] sm:$0xff] }
  0x11   :  { %352 = vmatpush.msra.mxu3 %v195_v24  ;;  %327 = vmatpush.msra.mxu2 %v178_v26  ;;  %v191_v40 = vld [vmem:[%s1267_s3 + $0x1b0] sm:$0xff]  ;;  %v158_v43 = vld [vmem:[%s1267_s3 + $0xa8] sm:$0xff]  ;;  %v173_v46 = vld [vmem:[%s1267_s3 + $0x120] sm:$0xff] }
  0x12   :  { %301 = vmatpush.msra.mxu1 %v162_v27  ;;  %276 = vmatpush.msra.mxu0 %v145_v29  ;;  %v190_v44 = vld [vmem:[%s1267_s3 + $0x1a8] sm:$0xff]  ;;  %v157_v47 = vld [vmem:[%s1267_s3 + $0xa0] sm:$0xff]  ;;  %v140_v49 = vld [vmem:[%s1267_s3 + $0x18] sm:$0xff] }
  0x13   :  { %353 = vmatpush.msra.mxu3 %v194_v28  ;;  %328 = vmatpush.msra.mxu2 %v177_v30  ;;  %v189_v48 = vld [vmem:[%s1267_s3 + $0x1a0] sm:$0xff]  ;;  %v172_v50 = vld [vmem:[%s1267_s3 + $0x118] sm:$0xff]  ;;  %v139_v53 = vld [vmem:[%s1267_s3 + $0x10] sm:$0xff] }
  0x14   :  { %302 = vmatpush.msra.mxu1 %v161_v31  ;;  %277 = vmatpush.msra.mxu0 %v144_v33  ;;  %v156_v51 = vld [vmem:[%s1267_s3 + $0x98] sm:$0xff]  ;;  %v171_v54 = vld [vmem:[%s1267_s3 + $0x110] sm:$0xff]  ;;  %v138_v57 = vld [vmem:[%s1267_s3 + $0x8] sm:$0xff] }
  0x15   :  { %354 = vmatpush.msra.mxu3 %v193_v32  ;;  %329 = vmatpush.msra.mxu2 %v176_v34  ;;  %v188_v52 = vld [vmem:[%s1267_s3 + $0x198] sm:$0xff]  ;;  %v155_v55 = vld [vmem:[%s1267_s3 + $0x90] sm:$0xff]  ;;  %v170_v58 = vld [vmem:[%s1267_s3 + $0x108] sm:$0xff] }
  0x16   :  { %303 = vmatpush.msra.mxu1 %v160_v35  ;;  %278 = vmatpush.msra.mxu0 %v143_v37  ;;  %v187_v56 = vld [vmem:[%s1267_s3 + $0x190] sm:$0xff]  ;;  %v865_v59 = vld [vmem:[%s1265_s1] sm:$0xff]  ;;  %v154_v61 = vld [vmem:[%s1267_s3 + $0x88] sm:$0xff] }
  0x17   :  { %355 = vmatpush.msra.mxu3 %v192_v36  ;;  %330 = vmatpush.msra.mxu2 %v175_v38  ;;  %v137_v60 = vld [vmem:[%s1267_s3] sm:$0xff]  ;;  %v186_v62 = vld [vmem:[%s1267_s3 + $0x188] sm:$0xff]  ;;  %v216_v0 = vld [vmem:[%s1267_s3 + $0x278] sm:$0xff]  ;;  %v886_v2 = vperm.slane %v865_v59, 0  ;;  %v889_v3 = vperm.slane %v865_v59, 2  ;;  %v918_v12 = vperm.slane %v865_v59, 1 }
  0x18   :  { %304 = vmatpush.msra.mxu1 %v159_v39  ;;  %279 = vmatpush.msra.mxu0 %v142_v41  ;;  %v169_v63 = vld [vmem:[%s1267_s3 + $0x100] sm:$0xff]  ;;  %v248_v1 = vld [vmem:[%s1267_s3 + $0x378] sm:$0xff]  ;;  %v32_v6 = vld [vmem:[%s1266_s2 + $0x10] sm:$0xff]  ;;  %v921_v13 = vperm.slane %v865_v59, 3 }
  0x19   :  { %356 = vmatpush.msra.mxu3 %v191_v40  ;;  %331 = vmatpush.msra.mxu2 %v174_v42  ;;  %v894_v4 = vld [vmem:[%s1264_s0] sm:$0xff]  ;;  %v215_v9 = vld [vmem:[%s1267_s3 + $0x270] sm:$0xff]  ;;  %v232_v10 = vld [vmem:[%s1267_s3 + $0x2f8] sm:$0xff]  ;;  %v74_v17 = vmul.f32 %v889_v3, %v32_v6 }
  0x1a   :  { %305 = vmatpush.msra.mxu1 %v158_v43  ;;  %280 = vmatpush.msra.mxu0 %v141_v45  ;;  %v30_v5 = vld [vmem:[%s1266_s2] sm:$0xff]  ;;  %v247_v11 = vld [vmem:[%s1267_s3 + $0x370] sm:$0xff]  ;;  %v264_v14 = vld [vmem:[%s1267_s3 + $0x3f8] sm:$0xff]  ;;  %v928_v16 = vperm.slane %v894_v4, 0  ;;  %v932_v18 = vperm.slane %v894_v4, 2  ;;  %v960_v28 = vperm.slane %v894_v4, 1 }
  0x1b   :  { %357 = vmatpush.msra.mxu3 %v190_v44  ;;  %332 = vmatpush.msra.mxu2 %v173_v46  ;;  %v153_v7 = vld [vmem:[%s1267_s3 + $0x80] sm:$0xff]  ;;  %v72_v15 = vmul.f32 %v886_v2, %v30_v5  ;;  %v31_v19 = vld [vmem:[%s1266_s2 + $0x8] sm:$0xff]  ;;  %v33_v20 = vld [vmem:[%s1266_s2 + $0x18] sm:$0xff]  ;;  %v964_v30 = vperm.slane %v894_v4, 3 }
  0x1c   :  { %306 = vmatpush.msra.mxu1 %v157_v47  ;;  %281 = vmatpush.msra.mxu0 %v140_v49  ;;  %v185_v8 = vld [vmem:[%s1267_s3 + $0x180] sm:$0xff]  ;;  %v214_v21 = vld [vmem:[%s1267_s3 + $0x268] sm:$0xff]  ;;  %v231_v22 = vld [vmem:[%s1267_s3 + $0x2f0] sm:$0xff]  ;;  %v73_v27 = vmul.f32 %v918_v12, %v31_v19  ;;  %v75_v29 = vmul.f32 %v921_v13, %v33_v20  ;;  %v115_v34 = vadd.f32 %v932_v18, %v74_v17 }
  0x1d   :  { %358 = vmatpush.msra.mxu3 %v189_v48  ;;  %333 = vmatpush.msra.mxu2 %v172_v50  ;;  %v246_v23 = vld [vmem:[%s1267_s3 + $0x368] sm:$0xff]  ;;  %v263_v24 = vld [vmem:[%s1267_s3 + $0x3f0] sm:$0xff]  ;;  %v213_v25 = vld [vmem:[%s1267_s3 + $0x260] sm:$0xff]  ;;  %v113_v33 = vadd.f32 %v928_v16, %v72_v15 }
  0x1e   :  { %307 = vmatpush.msra.mxu1 %v156_v51  ;;  %282 = vmatpush.msra.mxu0 %v139_v53  ;;  %v230_v26 = vld [vmem:[%s1267_s3 + $0x2e8] sm:$0xff]  ;;  %v245_v31 = vld [vmem:[%s1267_s3 + $0x360] sm:$0xff]  ;;  %v212_v35 = vld [vmem:[%s1267_s3 + $0x258] sm:$0xff]  ;;  %v114_v39 = vadd.f32 %v960_v28, %v73_v27  ;;  %v116_v40 = vadd.f32 %v964_v30, %v75_v29 }
  0x1f   :  { %359 = vmatpush.msra.mxu3 %v188_v52  ;;  %334 = vmatpush.msra.mxu2 %v171_v54  ;;  %v262_v32 = vld [vmem:[%s1267_s3 + $0x3e8] sm:$0xff]  ;;  %v229_v36 = vld [vmem:[%s1267_s3 + $0x2e0] sm:$0xff]  ;;  %v244_v37 = vld [vmem:[%s1267_s3 + $0x358] sm:$0xff] }
  0x20   :  { %308 = vmatpush.msra.mxu1 %v155_v55  ;;  %283 = vmatpush.msra.mxu0 %v138_v57  ;;  %v261_v38 = vld [vmem:[%s1267_s3 + $0x3e0] sm:$0xff]  ;;  %v40_v42 = vld [vmem:[%s1266_s2 + $0x50] sm:$0xff]  ;;  %v228_v44 = vld [vmem:[%s1267_s3 + $0x2d8] sm:$0xff] }
  0x21   :  { %360 = vmatpush.msra.mxu3 %v187_v56  ;;  %335 = vmatpush.msra.mxu2 %v170_v58  ;;  %v38_v41 = vld [vmem:[%s1266_s2 + $0x40] sm:$0xff]  ;;  %v211_v43 = vld [vmem:[%s1267_s3 + $0x250] sm:$0xff]  ;;  %v260_v46 = vld [vmem:[%s1267_s3 + $0x3d8] sm:$0xff]  ;;  %v82_v48 = vmul.f32 %v889_v3, %v40_v42 }
  0x22   :  { %309 = vmatpush.msra.mxu1 %v154_v61  ;;  %284 = vmatpush.msra.mxu0 %v137_v60  ;;  %v243_v45 = vld [vmem:[%s1267_s3 + $0x350] sm:$0xff]  ;;  %v80_v47 = vmul.f32 %v886_v2, %v38_v41  ;;  %v39_v49 = vld [vmem:[%s1266_s2 + $0x48] sm:$0xff]  ;;  %v41_v50 = vld [vmem:[%s1266_s2 + $0x58] sm:$0xff] }
  0x23   :  { %361 = vmatpush.msra.mxu3 %v186_v62  ;;  %336 = vmatpush.msra.mxu2 %v169_v63  ;;  %v210_v51 = vld [vmem:[%s1267_s3 + $0x248] sm:$0xff]  ;;  %v227_v52 = vld [vmem:[%s1267_s3 + $0x2d0] sm:$0xff]  ;;  %v209_v55 = vld [vmem:[%s1267_s3 + $0x240] sm:$0xff]  ;;  %v81_v57 = vmul.f32 %v918_v12, %v39_v49  ;;  %v83_v58 = vmul.f32 %v921_v13, %v41_v50  ;;  %v123_v63 = vadd.f32 %v932_v18, %v82_v48 }
  0x24   :  { %373 = vmatpush.msrb.mxu0 %v216_v0  ;;  %310 = vmatpush.msra.mxu1 %v153_v7  ;;  %v242_v53 = vld [vmem:[%s1267_s3 + $0x348] sm:$0xff]  ;;  %v259_v54 = vld [vmem:[%s1267_s3 + $0x3d0] sm:$0xff]  ;;  %v241_v60 = vld [vmem:[%s1267_s3 + $0x340] sm:$0xff]  ;;  %v121_v62 = vadd.f32 %v928_v16, %v80_v47 }
  0x25   :  { %425 = vmatpush.msrb.mxu2 %v248_v1  ;;  %362 = vmatpush.msra.mxu3 %v185_v8  ;;  %v226_v56 = vld [vmem:[%s1267_s3 + $0x2c8] sm:$0xff]  ;;  %v208_v0 = vld [vmem:[%s1267_s3 + $0x238] sm:$0xff]  ;;  %v225_v1 = vld [vmem:[%s1267_s3 + $0x2c0] sm:$0xff]  ;;  %v122_v7 = vadd.f32 %v960_v28, %v81_v57  ;;  %v124_v8 = vadd.f32 %v964_v30, %v83_v58 }
  0x26   :  { %374 = vmatpush.msrb.mxu0 %v215_v9  ;;  %399 = vmatpush.msrb.mxu1 %v232_v10  ;;  %v258_v61 = vld [vmem:[%s1267_s3 + $0x3c8] sm:$0xff]  ;;  %v240_v5 = vld [vmem:[%s1267_s3 + $0x338] sm:$0xff]  ;;  %v257_v6 = vld [vmem:[%s1267_s3 + $0x3c0] sm:$0xff] }
  0x27   :  { %426 = vmatpush.msrb.mxu2 %v247_v11  ;;  %451 = vmatpush.msrb.mxu3 %v264_v14  ;;  %v207_v9 = vld [vmem:[%s1267_s3 + $0x230] sm:$0xff]  ;;  %v46_v10 = vld [vmem:[%s1266_s2 + $0x80] sm:$0xff]  ;;  %v224_v14 = vld [vmem:[%s1267_s3 + $0x2b8] sm:$0xff] }
  0x28   :  { %375 = vmatpush.msrb.mxu0 %v214_v21  ;;  %400 = vmatpush.msrb.mxu1 %v231_v22  ;;  %v48_v11 = vld [vmem:[%s1266_s2 + $0x90] sm:$0xff]  ;;  %v256_v17 = vld [vmem:[%s1267_s3 + $0x3b8] sm:$0xff]  ;;  %v47_v19 = vld [vmem:[%s1266_s2 + $0x88] sm:$0xff]  ;;  %v88_v21 = vmul.f32 %v886_v2, %v46_v10 }
  0x29   :  { %427 = vmatpush.msrb.mxu2 %v246_v23  ;;  %452 = vmatpush.msrb.mxu3 %v263_v24  ;;  %v239_v15 = vld [vmem:[%s1267_s3 + $0x330] sm:$0xff]  ;;  %v49_v20 = vld [vmem:[%s1266_s2 + $0x98] sm:$0xff]  ;;  %v90_v22 = vmul.f32 %v889_v3, %v48_v11 }
  0x2a   :  { %376 = vmatpush.msrb.mxu0 %v213_v25  ;;  %401 = vmatpush.msrb.mxu1 %v230_v26 }
  0x2b   :  { %428 = vmatpush.msrb.mxu2 %v245_v31  ;;  %453 = vmatpush.msrb.mxu3 %v262_v32 }
  0x2c   :  { %285 = vmatmul.f32.vlgmr.msra.gmra.mxu0 %v113_v33  ;;  %337 = vmatmul.f32.vlgmr.msra.gmra.mxu2 %v115_v34 }
  0x2d   :  { %377 = vmatpush.msrb.mxu0 %v212_v35  ;;  %402 = vmatpush.msrb.mxu1 %v229_v36 }
  0x2e   :  { %429 = vmatpush.msrb.mxu2 %v244_v37  ;;  %454 = vmatpush.msrb.mxu3 %v261_v38 }
  0x2f   :  { %311 = vmatmul.f32.vlgmr.msra.gmra.mxu1 %v114_v39  ;;  %363 = vmatmul.f32.vlgmr.msra.gmra.mxu3 %v116_v40 }
  0x30   :  { %378 = vmatpush.msrb.mxu0 %v211_v43  ;;  %403 = vmatpush.msrb.mxu1 %v228_v44 }
  0x31   :  { %430 = vmatpush.msrb.mxu2 %v243_v45  ;;  %455 = vmatpush.msrb.mxu3 %v260_v46 }
  0x32   :  { %379 = vmatpush.msrb.mxu0 %v210_v51  ;;  %404 = vmatpush.msrb.mxu1 %v227_v52 }
  0x33   :  { %431 = vmatpush.msrb.mxu2 %v242_v53  ;;  %456 = vmatpush.msrb.mxu3 %v259_v54 }
  0x34   :  { %380 = vmatpush.msrb.mxu0 %v209_v55  ;;  %405 = vmatpush.msrb.mxu1 %v226_v56 }
  0x35   :  { %432 = vmatpush.msrb.mxu2 %v241_v60  ;;  %457 = vmatpush.msrb.mxu3 %v258_v61 }
  0x36   :  { %288 = vmatmul.f32.gmra.mxu0 %v121_v62  ;;  %340 = vmatmul.f32.gmra.mxu2 %v123_v63 }
  0x37   :  { %381 = vmatpush.msrb.mxu0 %v208_v0  ;;  %406 = vmatpush.msrb.mxu1 %v225_v1 }
  0x38   :  { %433 = vmatpush.msrb.mxu2 %v240_v5  ;;  %458 = vmatpush.msrb.mxu3 %v257_v6 }
  0x39   :  { %14 = vsyncpa [#allocation4], 0  ;;  %314 = vmatmul.f32.gmra.mxu1 %v122_v7  ;;  %366 = vmatmul.f32.gmra.mxu3 %v124_v8  ;;  %v206_v23 = vld [vmem:[%s1267_s3 + $0x228] sm:$0xff]  ;;  %v223_v24 = vld [vmem:[%s1267_s3 + $0x2b0] sm:$0xff]  ;;  %v89_v27 = vmul.f32 %v918_v12, %v47_v19  ;;  %v91_v29 = vmul.f32 %v921_v13, %v49_v20  ;;  %v129_v33 = vadd.f32 %v928_v16, %v88_v21  ;;  %v1120_v16 = vperm.slane %v865_v59, 4  ;;  %s593_s11 = sshll.u32 %s1271_s7, 4  ;;  %s594_s11 = int_to_ptr.hbm [resolvable:$true] %s593_s11 }
  0x3a   :  { %382 = vmatpush.msrb.mxu0 %v207_v9  ;;  %407 = vmatpush.msrb.mxu1 %v224_v14  ;;  %v238_v25 = vld [vmem:[%s1267_s3 + $0x328] sm:$0xff]  ;;  %v255_v2 = vld [vmem:[%s1267_s3 + $0x3b0] sm:$0xff]  ;;  %v205_v3 = vld [vmem:[%s1267_s3 + $0x220] sm:$0xff]  ;;  %v131_v34 = vadd.f32 %v932_v18, %v90_v22  ;;  %v1123_v18 = vperm.slane %v865_v59, 6  ;;  %v1140_v42 = vperm.slane %v865_v59, 5  ;;  %v1162_v47 = vperm.slane %v894_v4, 4 }
  0x3b   :  { %434 = vmatpush.msrb.mxu2 %v239_v15  ;;  %459 = vmatpush.msrb.mxu3 %v256_v17  ;;  %v222_v26 = vld [vmem:[%s1267_s3 + $0x2a8] sm:$0xff]  ;;  %v237_v31 = vld [vmem:[%s1267_s3 + $0x320] sm:$0xff]  ;;  %v204_v12 = vld [vmem:[%s1267_s3 + $0x218] sm:$0xff]  ;;  %v130_v37 = vadd.f32 %v960_v28, %v89_v27  ;;  %v132_v38 = vadd.f32 %v964_v30, %v91_v29  ;;  %v1143_v28 = vperm.slane %v865_v59, 7  ;;  %v1166_v49 = vperm.slane %v894_v4, 6 }
  0x3c   :  { %383 = vmatpush.msrb.mxu0 %v206_v23  ;;  %408 = vmatpush.msrb.mxu1 %v223_v24  ;;  %v254_v32 = vld [vmem:[%s1267_s3 + $0x3a8] sm:$0xff]  ;;  %v221_v13 = vld [vmem:[%s1267_s3 + $0x2a0] sm:$0xff]  ;;  %v236_v35 = vld [vmem:[%s1267_s3 + $0x318] sm:$0xff]  ;;  %v102_v55 = vperm.slane %v894_v4, 5  ;;  %v104_v57 = vperm.slane %v894_v4, 7  ;;  %vm487_vm0 = vcmask 261120  }
  0x3d   :  { %435 = vmatpush.msrb.mxu2 %v238_v25  ;;  %460 = vmatpush.msrb.mxu3 %v255_v2  ;;  %v253_v36 = vld [vmem:[%s1267_s3 + $0x3a0] sm:$0xff]  ;;  %v36_v40 = vld [vmem:[%s1266_s2 + $0x30] sm:$0xff]  ;;  %v220_v30 = vld [vmem:[%s1267_s3 + $0x298] sm:$0xff]  ;;  %vm571_vm11 = vcmask 7168   ;;  %vm584_vm15 = vcmask 0  }
  0x3e   :  { %384 = vmatpush.msrb.mxu0 %v205_v3  ;;  %409 = vmatpush.msrb.mxu1 %v222_v26  ;;  %v34_v39 = vld [vmem:[%s1266_s2 + $0x20] sm:$0xff]  ;;  %v203_v41 = vld [vmem:[%s1267_s3 + $0x210] sm:$0xff]  ;;  %v35_v43 = vld [vmem:[%s1266_s2 + $0x28] sm:$0xff]  ;;  %v78_v48 = vmul.f32 %v1123_v18, %v36_v40 }
  0x3f   :  { %436 = vmatpush.msrb.mxu2 %v237_v31  ;;  %461 = vmatpush.msrb.mxu3 %v254_v32  ;;  %v37_v44 = vld [vmem:[%s1266_s2 + $0x38] sm:$0xff]  ;;  %v235_v59 = vld [vmem:[%s1267_s3 + $0x310] sm:$0xff]  ;;  %v76_v46 = vmul.f32 %v1120_v16, %v34_v39  ;;  %v202_v50 = vld [vmem:[%s1267_s3 + $0x208] sm:$0xff]  ;;  %v77_v54 = vmul.f32 %v1140_v42, %v35_v43 }
  0x40   :  { %291 = vmatmul.f32.gmra.mxu0 %v129_v33  ;;  %343 = vmatmul.f32.gmra.mxu2 %v131_v34  ;;  %v252_v45 = vld [vmem:[%s1267_s3 + $0x398] sm:$0xff]  ;;  %v219_v51 = vld [vmem:[%s1267_s3 + $0x290] sm:$0xff]  ;;  %v234_v52 = vld [vmem:[%s1267_s3 + $0x308] sm:$0xff]  ;;  %v79_v56 = vmul.f32 %v1143_v28, %v37_v44  ;;  %v119_v63 = vadd.f32 %v1166_v49, %v78_v48 }
  0x41   :  { %385 = vmatpush.msrb.mxu0 %v204_v12  ;;  %410 = vmatpush.msrb.mxu1 %v221_v13  ;;  %v251_v53 = vld [vmem:[%s1267_s3 + $0x390] sm:$0xff]  ;;  %v201_v58 = vld [vmem:[%s1267_s3 + $0x200] sm:$0xff]  ;;  %v218_v60 = vld [vmem:[%s1267_s3 + $0x288] sm:$0xff]  ;;  %v117_v62 = vadd.f32 %v1162_v47, %v76_v46  ;;  %v118_v7 = vadd.f32 %v102_v55, %v77_v54 }
  0x42   :  { %437 = vmatpush.msrb.mxu2 %v236_v35  ;;  %462 = vmatpush.msrb.mxu3 %v253_v36  ;;  %v233_v61 = vld [vmem:[%s1267_s3 + $0x300] sm:$0xff]  ;;  %v250_v4 = vld [vmem:[%s1267_s3 + $0x388] sm:$0xff]  ;;  %v44_v1 = vld [vmem:[%s1266_s2 + $0x70] sm:$0xff]  ;;  %v120_v8 = vadd.f32 %v104_v57, %v79_v56 }
  0x43   :  { %317 = vmatmul.f32.gmra.mxu1 %v130_v37  ;;  %369 = vmatmul.f32.gmra.mxu3 %v132_v38  ;;  %v42_v0 = vld [vmem:[%s1266_s2 + $0x60] sm:$0xff]  ;;  %v43_v9 = vld [vmem:[%s1266_s2 + $0x68] sm:$0xff]  ;;  %v45_v10 = vld [vmem:[%s1266_s2 + $0x78] sm:$0xff]  ;;  %v86_v14 = vmul.f32 %v1123_v18, %v44_v1 }
  0x44   :  { %386 = vmatpush.msrb.mxu0 %v203_v41  ;;  %411 = vmatpush.msrb.mxu1 %v220_v30  ;;  %v217_v5 = vld [vmem:[%s1267_s3 + $0x280] sm:$0xff]  ;;  %v84_v11 = vmul.f32 %v1120_v16, %v42_v0  ;;  %v85_v15 = vmul.f32 %v1140_v42, %v43_v9  ;;  %v87_v17 = vmul.f32 %v1143_v28, %v45_v10  ;;  %v52_v22 = vld [vmem:[%s1266_s2 + $0xb0] sm:$0xff]  ;;  %v51_v25 = vld [vmem:[%s1266_s2 + $0xa8] sm:$0xff] }
  0x45   :  { %438 = vmatpush.msrb.mxu2 %v235_v59  ;;  %463 = vmatpush.msrb.mxu3 %v252_v45  ;;  %v249_v6 = vld [vmem:[%s1267_s3 + $0x380] sm:$0xff]  ;;  %v127_v20 = vadd.f32 %v1166_v49, %v86_v14  ;;  %v53_v2 = vld [vmem:[%s1266_s2 + $0xb8] sm:$0xff]  ;;  %v94_v26 = vmul.f32 %v1123_v18, %v52_v22  ;;  %v93_v27 = vmul.f32 %v1140_v42, %v51_v25 }
  0x46   :  { %387 = vmatpush.msrb.mxu0 %v202_v50  ;;  %412 = vmatpush.msrb.mxu1 %v219_v51  ;;  %v125_v19 = vadd.f32 %v1162_v47, %v84_v11  ;;  %v50_v21 = vld [vmem:[%s1266_s2 + $0xa0] sm:$0xff]  ;;  %v126_v23 = vadd.f32 %v102_v55, %v85_v15  ;;  %v128_v24 = vadd.f32 %v104_v57, %v87_v17 }
  0x47   :  { %439 = vmatpush.msrb.mxu2 %v234_v52  ;;  %464 = vmatpush.msrb.mxu3 %v251_v53  ;;  %v92_v3 = vmul.f32 %v1120_v16, %v50_v21  ;;  %v95_v29 = vmul.f32 %v1143_v28, %v53_v2  ;;  %v135_v32 = vadd.f32 %v1166_v49, %v94_v26  ;;  %v603_v36 = vld [vmem:[%s1268_s4] ss:$0 sm:$0xff] }
  0x48   :  { %388 = vmatpush.msrb.mxu0 %v201_v58  ;;  %413 = vmatpush.msrb.mxu1 %v218_v60  ;;  %v134_v33 = vadd.f32 %v102_v55, %v93_v27 }
  0x49   :  { %440 = vmatpush.msrb.mxu2 %v233_v61  ;;  %465 = vmatpush.msrb.mxu3 %v250_v4  ;;  %v133_v31 = vadd.f32 %v1162_v47, %v92_v3  ;;  %v136_v34 = vadd.f32 %v104_v57, %v95_v29  ;;  %v604_v4 = vld [vmem:[%s1269_s5] ss:$0 sm:$0xff]  ;;  %s644_s5 = smov [#allocation3]  }
  0x4a   :  { %389 = vmatmul.f32.vlgmr.msrb.gmra.mxu0 %v117_v62  ;;  %441 = vmatmul.f32.vlgmr.msrb.gmra.mxu2 %v119_v63  ;;  %v605_v29 = vld [vmem:[#allocation2] ss:$0 sm:$0xff]  ;;  %s591_s9 = sshll.u32 %s644_s5, 4  ;;  %s592_s9 = int_to_ptr.vmem [resolvable:$true] %s591_s9 }
  0x4b   :  { %414 = vmatpush.msrb.mxu1 %v217_v5  ;;  %466 = vmatpush.msrb.mxu3 %v249_v6 }
  0x4c   :  { %415 = vmatmul.f32.vlgmr.msrb.gmra.mxu1 %v118_v7  ;;  %467 = vmatmul.f32.vlgmr.msrb.gmra.mxu3 %v120_v8 }
  0x52   :  { %392 = vmatmul.f32.gmra.mxu0 %v125_v19  ;;  %444 = vmatmul.f32.gmra.mxu2 %v127_v20 }
  0x54   :  { %418 = vmatmul.f32.gmra.mxu1 %v126_v23  ;;  %470 = vmatmul.f32.gmra.mxu3 %v128_v24 }
  0x5a   :  { %395 = vmatmul.f32.gmra.mxu0 %v133_v31  ;;  %447 = vmatmul.f32.gmra.mxu2 %v135_v32 }
  0x5c   :  { %421 = vmatmul.f32.gmra.mxu1 %v134_v33  ;;  %473 = vmatmul.f32.gmra.mxu3 %v136_v34 }
  0xa9   :  { %v286_v12 = vpop.f32.mrf.mxu0 }
  0xaa   :  { %v287_v39 = vadd.f32 %v603_v36, %v286_v12 }
  0xac   :  { %v312_v13 = vpop.f32.mrf.mxu1 }
  0xad   :  { %v313_v42 = vadd.f32 %v312_v13, %v287_v39 }
  0xaf   :  { %v338_v35 = vpop.f32.mrf.mxu2 }
  0xb0   :  { %v339_v30 = vadd.f32 %v338_v35, %v313_v42 }
  0xb2   :  { %v364_v16 = vpop.f32.mrf.mxu3 }
  0xb3   :  { %v289_v18 = vpop.f32.mrf.mxu0  ;;  %v365_v59 = vadd.f32 %v364_v16, %v339_v30 }
  0xb4   :  { %v290_v43 = vadd.f32 %v603_v36, %v289_v18 }
  0xb6   :  { %v315_v37 = vpop.f32.mrf.mxu1 }
  0xb7   :  { %v316_v45 = vadd.f32 %v315_v37, %v290_v43 }
  0xb9   :  { %v341_v38 = vpop.f32.mrf.mxu2 }
  0xba   :  { %v342_v50 = vadd.f32 %v341_v38, %v316_v45 }
  0xbc   :  { %v367_v40 = vpop.f32.mrf.mxu3 }
  0xbd   :  { %v292_v41 = vpop.f32.mrf.mxu0  ;;  %v368_v54 = vadd.f32 %v367_v40, %v342_v50 }
  0xbe   :  { %v293_v51 = vadd.f32 %v603_v36, %v292_v41 }
  0xc0   :  { %v318_v28 = vpop.f32.mrf.mxu1 }
  0xc1   :  { %v319_v55 = vadd.f32 %v318_v28, %v293_v51 }
  0xc3   :  { %v344_v44 = vpop.f32.mrf.mxu2 }
  0xc4   :  { %v345_v63 = vadd.f32 %v344_v44, %v319_v55 }
  0xc6   :  { %v370_v46 = vpop.f32.mrf.mxu3 }
  0xc7   :  { %v390_v47 = vpop.f32.mrf.mxu0  ;;  %v371_v7 = vadd.f32 %v370_v46, %v345_v63 }
  0xc8   :  { %v391_v48 = vadd.f32 %v390_v47, %v365_v59 }
  0xc9   :  { %v416_v49 = vpop.f32.mrf.mxu1 }
  0xca   :  { %v417_v52 = vadd.f32 %v416_v49, %v391_v48  ;;  %v561_v48 = vlaneseq }
  0xcd   :  { %v442_v53 = vpop.f32.mrf.mxu2 }
  0xce   :  { %v443_v56 = vadd.f32 %v442_v53, %v417_v52 }
  0xcf   :  { %v393_v57 = vpop.f32.mrf.mxu0  ;;  %v468_v58 = vpop.f32.mrf.mxu3 }
  0xd0   :  { %v394_v60 = vadd.f32 %v393_v57, %v368_v54  ;;  %v469_v61 = vadd.f32 %v468_v58, %v443_v56  ;;  %v562_v54 = vshrl.u32 %v561_v48, 7 }
  0xd1   :  { %v419_v62 = vpop.f32.mrf.mxu1 }
  0xd2   :  { %v477_v0 = vmax.f32 %v469_v61, 0.0  ;;  %v420_v1 = vadd.f32 %v419_v62, %v394_v60 }
  0xd4   :  { %v484_v5 = vmul.f32 %v604_v4, %v477_v0 }
  0xd5   :  { %v445_v6 = vpop.f32.mrf.mxu2 }
  0xd6   :  { %v446_v8 = vadd.f32 %v445_v6, %v420_v1  ;;  %v488_v9 = vsel %vm487_vm0, %v484_v5, 0.0  ;;  %v564_v1 = vadd.s32 16, %v562_v54 }
  0xd7   :  { %v396_v10 = vpop.f32.mrf.mxu0  ;;  %v471_v11 = vpop.f32.mrf.mxu3  ;;  %489 = vadd.xlane.f32.xlu0 %v488_v9 }
  0xd8   :  { %v397_v14 = vadd.f32 %v396_v10, %v371_v7  ;;  %v472_v15 = vadd.f32 %v471_v11, %v446_v8  ;;  %vm567_vm13 = vcmp.lt.s32.totalorder %v564_v1, 20 }
  0xd9   :  { %v422_v17 = vpop.f32.mrf.mxu1 }
  0xda   :  { %v478_v19 = vmax.f32 %v472_v15, 0.0  ;;  %v423_v20 = vadd.f32 %v422_v17, %v397_v14 }
  0xdc   :  { %v485_v21 = vmul.f32 %v604_v4, %v478_v19 }
  0xdd   :  { %v448_v22 = vpop.f32.mrf.mxu2 }
  0xde   :  { %v449_v23 = vadd.f32 %v448_v22, %v423_v20  ;;  %v491_v24 = vsel %vm487_vm0, %v485_v21, 0.0 }
  0xdf   :  { %v474_v25 = vpop.f32.mrf.mxu3  ;;  %492 = vadd.xlane.f32.xlu0 %v491_v24 }
  0xe0   :  { %v475_v2 = vadd.f32 %v474_v25, %v449_v23 }
  0xe2   :  { %v479_v3 = vmax.f32 %v475_v2, 0.0 }
  0xe4   :  { %v486_v26 = vmul.f32 %v604_v4, %v479_v3 }
  0xe6   :  { %v494_v27 = vsel %vm487_vm0, %v486_v26, 0.0 }
  0xe7   :  { %495 = vadd.xlane.f32.xlu1 %v494_v27 }
 0x14a   :  { %v490_v31 = vpop.xlane.xlu0 %489 }
 0x14b   :  { %v501_v32 = vadd.f32 %v605_v29, %v490_v31 }
 0x14d   :  { %v504_v33 = vsub.f32 0.0, %v501_v32 }
 0x14f   :  { %v507_v34 = vmul.f32 1.442695, %v504_v33 }
 0x151   :  { %606 = vpow2.f32 %v507_v34 }
 0x152   :  { %v493_v12 = vpop.xlane.xlu0 %492 }
 0x153   :  { %v502_v13 = vadd.f32 %v605_v29, %v493_v12 }
 0x155   :  { %v505_v35 = vsub.f32 0.0, %v502_v13 }
 0x157   :  { %v607_v16 = vpop.eup %606  ;;  %v509_v18 = vmul.f32 1.442695, %v505_v35 }
 0x158   :  { %v513_v36 = vadd.f32 1.0, %v607_v16 }
 0x159   :  { %608 = vpow2.f32 %v509_v18 }
 0x15a   :  { %v496_v37 = vpop.xlane.xlu1 %495  ;;  %610 = vrcp.f32 %v513_v36  ;;  %v527_v51 = vand.u32 2147483648, %v513_v36  ;;  %vm521_vm5 = vweird.f32 %v513_v36  ;;  %v525_v61 = vand.u32 2147483647, %v513_v36 }
 0x15b   :  { %v503_v38 = vadd.f32 %v605_v29, %v496_v37 }
 0x15c   :  { %v528_v5 = vor.u32 1.1754944e-38, %v527_v51  ;;  %vm526_vm9 = vcmp.eq.f32.partialorder %v525_v61, 8.507059e+37 }
 0x15d   :  { %v506_v39 = vsub.f32 0.0, %v503_v38 }
 0x15f   :  { %v609_v40 = vpop.eup %608  ;;  %v511_v41 = vmul.f32 1.442695, %v506_v39 }
 0x160   :  { %v514_v42 = vadd.f32 1.0, %v609_v40  ;;  %v611_v28 = vpop.eup %610 }
 0x161   :  { %612 = vpow2.f32 %v511_v41  ;;  %v517_v30 = vmul.f32 %v611_v28, %v513_v36  ;;  %vm522_vm2 = vweird.f32 %v611_v28 }
 0x162   :  { %614 = vrcp.f32 %v514_v42  ;;  %v542_v53 = vand.u32 2147483648, %v514_v42  ;;  %vm536_vm3 = vweird.f32 %v514_v42  ;;  %v540_v57 = vand.u32 2147483647, %v514_v42  ;;  %vm1255_vm6 = vmor %vm521_vm5, %vm522_vm2 }
 0x163   :  { %v518_v59 = vsub.f32 1.0, %v517_v30 }
 0x164   :  { %v543_v63 = vor.u32 1.1754944e-38, %v542_v53  ;;  %vm541_vm7 = vcmp.eq.f32.partialorder %v540_v57, 8.507059e+37 }
 0x165   :  { %v519_v49 = vmul.f32 %v611_v28, %v518_v59 }
 0x167   :  { %v613_v43 = vpop.eup %612  ;;  %v520_v56 = vadd.f32 %v611_v28, %v519_v49 }
 0x168   :  { %v615_v44 = vpop.eup %614  ;;  %v515_v45 = vadd.f32 1.0, %v613_v43 }
 0x169   :  { %v532_v46 = vmul.f32 %v615_v44, %v514_v42  ;;  %vm537_vm1 = vweird.f32 %v615_v44  ;;  %v524_v7 = vsel %vm1255_vm6, %v611_v28, %v520_v56 }
 0x16a   :  { %616 = vrcp.f32 %v515_v45  ;;  %vm1249_vm4 = vmor %vm536_vm3, %vm537_vm1  ;;  %v557_v6 = vand.u32 2147483648, %v515_v45  ;;  %v555_v9 = vand.u32 2147483647, %v515_v45  ;;  %vm551_vm10 = vweird.f32 %v515_v45 }
 0x16b   :  { %v533_v47 = vsub.f32 1.0, %v532_v46  ;;  %v529_v14 = vsel %vm526_vm9, %v528_v5, %v524_v7 }
 0x16c   :  { %v558_v15 = vor.u32 1.1754944e-38, %v557_v6  ;;  %vm556_vm14 = vcmp.eq.f32.partialorder %v555_v9, 8.507059e+37  ;;  %v572_v21 = vsel %vm571_vm11, %v529_v14, 0.0 }
 0x16d   :  { %v534_v50 = vmul.f32 %v615_v44, %v533_v47 }
 0x16f   :  { %v535_v52 = vadd.f32 %v615_v44, %v534_v50 }
 0x170   :  { %v617_v55 = vpop.eup %616 }
 0x171   :  { %v547_v60 = vmul.f32 %v617_v55, %v515_v45  ;;  %v539_v4 = vsel %vm1249_vm4, %v615_v44, %v535_v52  ;;  %vm552_vm8 = vweird.f32 %v617_v55 }
 0x172   :  { %v544_v10 = vsel %vm541_vm7, %v543_v63, %v539_v4  ;;  %vm553_vm12 = vmor %vm551_vm10, %vm552_vm8 }
 0x173   :  { %v548_v0 = vsub.f32 1.0, %v547_v60  ;;  %v573_v17 = vsel %vm571_vm11, %v544_v10, 0.0 }
 0x174   :  { %v574_v23 = vadd.f32 %v573_v17, %v572_v21 }
 0x175   :  { %v549_v8 = vmul.f32 %v617_v55, %v548_v0 }
 0x177   :  { %v550_v11 = vadd.f32 %v617_v55, %v549_v8 }
 0x179   :  { %v554_v19 = vsel %vm553_vm12, %v617_v55, %v550_v11 }
 0x17a   :  { %v559_v20 = vsel %vm556_vm14, %v558_v15, %v554_v19 }
 0x17b   :  { %v570_v22 = vsel %vm567_vm13, %v559_v20, 0.0 }
 0x17c   :  { %v575_v24 = vsel %vm571_vm11, %v570_v22, 0.0 }
 0x17d   :  { %v576_v25 = vadd.f32 %v575_v24, %v574_v23 }
 0x17f   :  { %v577_v2 = vrot.slane %v576_v25, 4 }
 0x181   :  { %v578_v3 = vadd.f32 %v577_v2, %v576_v25 }
 0x183   :  { %v579_v26 = vrot.slane %v578_v3, 2 }
 0x185   :  { %v580_v27 = vadd.f32 %v579_v26, %v578_v3 }
 0x187   :  { %v581_v29 = vrot.slane %v580_v27, 1 }
 0x189   :  { %v582_v31 = vadd.f32 %v581_v29, %v580_v27 }
 0x18b   :  { %v583_v32 = vmul.f32 0.05, %v582_v31 }
 0x18d   :  { %585 = vst.msk [vmem:[#allocation3] sm:$0x1] %vm584_vm15, %v583_v32 }
 0x18e   :  { %596 = dma.vmem_to_hbm [thread:$0]  %s592_s9, 16, %s594_s11, [#allocation4]  }
 0x18f   :  { %642 = dma.done.wait [#allocation4], 16  }
 0x190   :  { %643 = vsyncadd [#allocation4], 4294967280 }
 0x191   :  { %601 = vsyncpa [#allocation4], 1 }

</bundles_post_ra>
